<compile_context>
chip_gen: v6e
topology: v6e:2x2x1
jax: 0.10.0
libtpu: 0.0.40
codegen_flags: <defaults>
</compile_context>

<pallas_src>
import jax
import jax.numpy as jnp
from jax import lax
from jax.experimental import pallas as pl
from jax.experimental.pallas import tpu as pltpu


def _convblock_kernel(x_ref, w_ref, b_ref, o_ref):
    # x_ref: (16*Cin, cb)  im2col column block (lane axis = B*H*W slice)
    # w_ref: (Cout, 16*Cin) fused weight matrix (resident across grid steps)
    # b_ref: (Cout, 1)      concatenated biases
    # o_ref: (Cout, cb)     lane-dense output slab
    acc = jnp.dot(w_ref[...], x_ref[...], preferred_element_type=jnp.float32)
    o_ref[...] = (acc + b_ref[...]).astype(o_ref.dtype)


@jax.jit
def conv_block(x_nchw, weights, biases):
    """x_nchw: (B, Cin, H, W). weights[i]: (d, Cin, k, k) for k=i+1. biases[i]: (d,)."""
    B, Cin, H, W = x_nchw.shape
    d = weights[0].shape[0]
    Cout = 4 * d
    KW = 4                       # largest kernel size -> shared tap window
    K = KW * KW * Cin            # im2col contraction dim, order = (ki, kj, Cin)
    cols = B * H * W

    # ---- im2col over the shared 4x4 window (hoisted into the wrapper) ------
    # 'same' padding for the largest kernel (k=4): top/left = 1, bottom/right = 2.
    # Transpose the raw input once so tap slices stack directly into
    # (16, Cin, B, H, W); the subsequent reshape is contiguity-preserving.
    x_cbhw = jnp.transpose(x_nchw, (1, 0, 2, 3))          # (Cin, B, H, W)
    x_pad = jnp.pad(x_cbhw, ((0, 0), (0, 0), (1, 2), (1, 2)))
    taps = [
        lax.slice(x_pad, (0, 0, ti, tj), (Cin, B, ti + H, tj + W))
        for ti in range(KW) for tj in range(KW)
    ]                                                     # 16 x (Cin, B, H, W)
    x_cols = jnp.stack(taps, axis=0).reshape(K, cols)     # (16*Cin, B*H*W)

    # ---- fuse the 4 conv weights into one (Cout, 16*Cin) matrix ------------
    # For kernel size k, tap (ki, kj) lands at window position (off+ki, off+kj)
    # with off = 1 - (k-1)//2 (matches PyTorch's asymmetric 'same' padding).
    w_rows = []
    for w in weights:            # w: (d, Cin, k, k)
        k = w.shape[-1]
        off = 1 - (k - 1) // 2
        w_rows.append(jnp.pad(
            w, ((0, 0), (0, 0), (off, KW - k - off), (off, KW - k - off))))
    w_full = jnp.concatenate(w_rows, axis=0)              # (Cout, Cin, 4, 4)
    w_fused = jnp.transpose(w_full, (0, 2, 3, 1)).reshape(Cout, K)  # (ki,kj,Cin)
    b_cat = jnp.concatenate(biases).reshape(Cout, 1)

    # ---- one lane-dense matmul per column block -----------------------------
    # Split B*H*W into lane-dense (multiple-of-128) column blocks: 2-way
    # "parallel" grid axis feeds both TensorCores on v7x; on v5e/v6e the extra
    # serial step costs < 1 us.
    num_col_blocks = 2 if cols % 256 == 0 else 1
    cb = cols // num_col_blocks
    # TODO(synk): at production shapes re-derive the column-block size against
    # v7x's 64 MiB VMEM and set vmem_limit_bytes; at these shapes everything
    # fits trivially (a few hundred KiB total).

    out_cols = pl.pallas_call(
        _convblock_kernel,
        out_shape=jax.ShapeDtypeStruct((Cout, cols), x_nchw.dtype),
        grid_spec=pltpu.PrefetchScalarGridSpec(
            num_scalar_prefetch=0,
            grid=(num_col_blocks,),
            in_specs=[
                pl.BlockSpec((K, cb), lambda c: (0, c)),
                pl.BlockSpec((Cout, K), lambda c: (0, 0)),
                pl.BlockSpec((Cout, 1), lambda c: (0, 0)),
            ],
            out_specs=pl.BlockSpec((Cout, cb), lambda c: (0, c)),
        ),
        compiler_params=pltpu.CompilerParams(
            dimension_semantics=("parallel",)),
    )(x_cols, w_fused, b_cat)

    # (Cout, B*H*W) -> (B, Cout, H, W)  (NCHW, matching the PyTorch concat)
    return jnp.transpose(out_cols.reshape(Cout, B, H, W), (1, 0, 2, 3))


def _reference(x_nchw, weights, biases):
    """Pure-JAX reference matching PyTorch Conv2d(padding='same') + concat."""
    pads = {1: (0, 0), 2: (0, 1), 3: (1, 1), 4: (1, 2)}
    outs = []
    for w, b in zip(weights, biases):
        k = w.shape[-1]
        y = lax.conv_general_dilated(
            x_nchw, w, window_strides=(1, 1),
            padding=[pads[k], pads[k]],
            dimension_numbers=("NCHW", "OIHW", "NCHW"),
            precision=lax.Precision.HIGHEST)
        outs.append(y + b[None, :, None, None])
    return jnp.concatenate(outs, axis=1)


if __name__ == "__main__":
    # Small shapes consistent with the module: batch=2, input_dim=4,
    # spatial=16x16, output_dim=32 (each conv produces d=8 channels).
    B, Cin, H, W = 2, 4, 16, 16
    output_dim = 32
    d = output_dim // 4

    key = jax.random.PRNGKey(0)
    keys = jax.random.split(key, 9)
    x = jax.random.normal(keys[0], (B, Cin, H, W), jnp.float32)

    weights, biases = [], []
    for i, k in enumerate((1, 2, 3, 4)):
        fan_in = Cin * k * k
        bound = 1.0 / (fan_in ** 0.5)  # PyTorch Conv2d default init range
        weights.append(jax.random.uniform(
            keys[1 + 2 * i], (d, Cin, k, k), jnp.float32, -bound, bound))
        biases.append(jax.random.uniform(
            keys[2 + 2 * i], (d,), jnp.float32, -bound, bound))

    out = conv_block(x, weights, biases)
    out = jax.block_until_ready(out)

    ref = _reference(x, weights, biases)
    assert out.shape == (B, 4 * d, H, W)
    assert jnp.allclose(out, ref, atol=2e-5, rtol=2e-5), "mismatch vs reference"

    print("KERNEL_OK")
</pallas_src>

<mosaic_0001>
module attributes {stable_mosaic.version = 11 : i64} {
  func.func @_convblock_kernel(%arg0: i32, %arg1: memref<64x256xf32, #tpu.memory_space<vmem>>, %arg2: memref<32x64xf32, #tpu.memory_space<vmem>>, %arg3: memref<32x1xf32, #tpu.memory_space<vmem>>, %arg4: memref<32x256xf32, #tpu.memory_space<vmem>>) attributes {dimension_semantics = [#tpu.dimension_semantics<parallel>], iteration_bounds = array<i64: 2>, scalar_prefetch = 0 : i64, scratch_operands = 0 : i64, tpu.core_type = #tpu.core_type<tc>, window_params = [{transform_indices = @transform_0, window_bounds = array<i64: 64, 256>}, {pipeline_mode = #tpu.pipeline_mode<synchronous>, transform_indices = @transform_1, window_bounds = array<i64: 32, 64>}, {pipeline_mode = #tpu.pipeline_mode<synchronous>, transform_indices = @transform_2, window_bounds = array<i64: 32, 1>}, {transform_indices = @transform_3, window_bounds = array<i64: 32, 256>}]} {
    %c0 = arith.constant 0 : index
    %c0_0 = arith.constant 0 : index
    %0 = vector.load %arg2[%c0, %c0_0] : memref<32x64xf32, #tpu.memory_space<vmem>>, vector<32x64xf32>
    %c0_1 = arith.constant 0 : index
    %c0_2 = arith.constant 0 : index
    %1 = vector.load %arg1[%c0_1, %c0_2] : memref<64x256xf32, #tpu.memory_space<vmem>>, vector<64x256xf32>
    %cst = arith.constant dense<0.000000e+00> : vector<32x256xf32>
    %2 = tpu.matmul %0, %1, %cst {dimension_numbers = #tpu.dot_dimension_numbers<[1], [0], [0], [1], [0, 0, 1, 1], [], []>} : vector<32x64xf32>, vector<64x256xf32>, vector<32x256xf32> -> vector<32x256xf32>
    %c0_3 = arith.constant 0 : index
    %c0_4 = arith.constant 0 : index
    %3 = vector.load %arg3[%c0_3, %c0_4] : memref<32x1xf32, #tpu.memory_space<vmem>>, vector<32x1xf32>
    %4 = vector.broadcast %3 : vector<32x1xf32> to vector<32x256xf32>
    %5 = arith.addf %2, %4 : vector<32x256xf32>
    %c0_5 = arith.constant 0 : index
    %c0_6 = arith.constant 0 : index
    %6 = vector.load %arg4[%c0_5, %c0_6] : memref<32x256xf32, #tpu.memory_space<vmem>>, vector<32x256xf32>
    tpu.vector_store %arg4[%c0_5, %c0_6], %5 {strides = array<i32>} : memref<32x256xf32, #tpu.memory_space<vmem>>, vector<32x256xf32>,
    return
  }
  func.func @transform_0(%arg0: i32) -> (i32, i32) {
    %c0_i32 = arith.constant 0 : i32
    %c0_i32_0 = arith.constant 0 : i32
    return %c0_i32, %arg0 : i32, i32
  }
  func.func @transform_1(%arg0: i32) -> (i32, i32) {
    %c0_i32 = arith.constant 0 : i32
    %c0_i32_0 = arith.constant 0 : i32
    %c0_i32_1 = arith.constant 0 : i32
    return %c0_i32, %c0_i32_0 : i32, i32
  }
  func.func @transform_2(%arg0: i32) -> (i32, i32) {
    %c0_i32 = arith.constant 0 : i32
    %c0_i32_0 = arith.constant 0 : i32
    %c0_i32_1 = arith.constant 0 : i32
    return %c0_i32, %c0_i32_0 : i32, i32
  }
  func.func @transform_3(%arg0: i32) -> (i32, i32) {
    %c0_i32 = arith.constant 0 : i32
    %c0_i32_0 = arith.constant 0 : i32
    return %c0_i32, %arg0 : i32, i32
  }
}

</mosaic_0001>

<bundles_post_ra>
// kernel: conv_block.1
= control target key start
LH: loop header
LB: loop body
LE: loop exit
PB: predicated region body
PF: predicated region fallthrough
CT: control target
= control target key end

     0   :  { %s579_s12 = smov 0   ;;  %s581_s13 = smov 0   ;;  %s729_s0 = inlined_call_operand.vmem [shape: f32[64,512], index: 0, kind: input, shape index: {}]   ;;  %s730_s1 = inlined_call_operand.vmem [shape: f32[32,64], index: 1, kind: input, shape index: {}]   ;;  %s731_s2 = inlined_call_operand.vmem [shape: f32[32,1], index: 2, kind: input, shape index: {}]   ;;  %s732_s3 = inlined_call_operand.vmem [shape: f32[32,512], index: 3, kind: output, shape index: {}]  }
   0x1   :  { %s583_s14 = smov 0  }
   0x2 LB: > { %s468_s15 = sadd.s32 4294967295, %s555_s14   ;;  %s596_s16 = sadd.s32 1, %s555_s14   ;;  %s555_s14 = sphi %s583_s14, %s736_s14   ;;  %s551_s13 = sphi %s581_s13, %s735_s13   ;;  %s547_s12 = sphi %s579_s12, %s734_s12  }
   0x3   : > { %s17_s17 = ssub.s32 %s555_s14, %s596_s16  ;;  %s20_s18 = sadd.s32 1, %s551_s13 }
   0x4   : > { %p18_p0 = scmp.eq.s32.totalorder %s17_s17, 0  ;;  %p27_p1 = scmp.ne.s32.totalorder %s551_s13, %s547_s12 }
   0x5   : > { %p28_p2 = scmp.eq.s32.totalorder %s555_s14, 0  ;;  %p99_p3 = scmp.eq.s32.totalorder %s468_s15, 1 }
   0x6   : > { %s607_s19 = scalar_select %p18_p0, %s551_s13, %s20_s18  }
   0x7   : > { %p29_p4 = por %p28_p2, %p27_p1  ;;  %p609_p5 = por %p99_p3, %p27_p1 }
   0x8   : > { %p471_p6 = scmp.ge.s32.totalorder %s555_s14, 2 }
   0xa   : > { %127 = sbr.rel (%p471_p6) target bundleno = 27 (0x1b), region = 24 }
   0xf   : > { %130 = sbr.rel (!%p29_p4) target bundleno = 27 (0x1b), region = 28  ;;  %s132_s21 = sand.u32 (%p29_p4), 1, %s551_s13  }
  0x10   : > { %s487_s22 = sshll.u32 (%p29_p4), %s555_s14, 4  ;;  %s472_s23 = sshll.u32 (%p29_p4), %s132_s21, 7 }
  0x11   : > { %s619_s26 = scalar_lea.vmem (%p29_p4), %s729_s0, %s487_s22  ;;  %s134_s27 = scalar_lea.vmem (%p29_p4), [#allocation2], %s472_s23 }
  0x12   : > { %v150_v0 = vld [vmem:[%s619_s26] sm:$0xff] (%p29_p4)  ;;  %v152_v1 = vld [vmem:[%s619_s26 + $0x8] sm:$0xff] (%p29_p4) }
  0x13   : > { %v154_v2 = vld [vmem:[%s619_s26 + $0x20] sm:$0xff] (%p29_p4)  ;;  %151 = vst [vmem:[%s134_s27] sm:$0xff] (%p29_p4), %v150_v0  ;;  %153 = vst [vmem:[%s134_s27 + $0x8] sm:$0xff] (%p29_p4), %v152_v1  ;;  %v156_v3 = vld [vmem:[%s619_s26 + $0x28] sm:$0xff] (%p29_p4) }
  0x14   : > { %155 = vst [vmem:[%s134_s27 + $0x10] sm:$0xff] %v154_v2  ;;  %v158_v4 = vld [vmem:[%s619_s26 + $0x40] sm:$0xff]  ;;  %v160_v5 = vld [vmem:[%s619_s26 + $0x48] sm:$0xff]  ;;  %157 = vst [vmem:[%s134_s27 + $0x18] sm:$0xff] %v156_v3 }
  0x15   : > { %159 = vst [vmem:[%s134_s27 + $0x20] sm:$0xff] %v158_v4  ;;  %161 = vst [vmem:[%s134_s27 + $0x28] sm:$0xff] %v160_v5  ;;  %v162_v6 = vld [vmem:[%s619_s26 + $0x60] sm:$0xff]  ;;  %v164_v7 = vld [vmem:[%s619_s26 + $0x68] sm:$0xff] }
  0x16   : > { %v166_v8 = vld [vmem:[%s619_s26 + $0x80] sm:$0xff]  ;;  %163 = vst [vmem:[%s134_s27 + $0x30] sm:$0xff] %v162_v6  ;;  %165 = vst [vmem:[%s134_s27 + $0x38] sm:$0xff] %v164_v7  ;;  %v168_v9 = vld [vmem:[%s619_s26 + $0x88] sm:$0xff] }
  0x17   : > { %167 = vst [vmem:[%s134_s27 + $0x40] sm:$0xff] %v166_v8  ;;  %v170_v10 = vld [vmem:[%s619_s26 + $0xa0] sm:$0xff]  ;;  %v172_v11 = vld [vmem:[%s619_s26 + $0xa8] sm:$0xff]  ;;  %169 = vst [vmem:[%s134_s27 + $0x48] sm:$0xff] %v168_v9 }
  0x18   : > { %171 = vst [vmem:[%s134_s27 + $0x50] sm:$0xff] %v170_v10  ;;  %173 = vst [vmem:[%s134_s27 + $0x58] sm:$0xff] %v172_v11  ;;  %v174_v12 = vld [vmem:[%s619_s26 + $0xc0] sm:$0xff]  ;;  %v176_v13 = vld [vmem:[%s619_s26 + $0xc8] sm:$0xff] }
  0x19   : > { %v178_v14 = vld [vmem:[%s619_s26 + $0xe0] sm:$0xff]  ;;  %175 = vst [vmem:[%s134_s27 + $0x60] sm:$0xff] %v174_v12  ;;  %177 = vst [vmem:[%s134_s27 + $0x68] sm:$0xff] %v176_v13  ;;  %v180_v15 = vld [vmem:[%s619_s26 + $0xe8] sm:$0xff] }
  0x1a   : > { %179 = vst [vmem:[%s134_s27 + $0x70] sm:$0xff] %v178_v14  ;;  %181 = vst [vmem:[%s134_s27 + $0x78] sm:$0xff] %v180_v15 }
  0x1b PF: > { %p475_p7 = scmp.ge.s32.totalorder %s555_s14, 1  ;;  %p186_p8 = scmp.lt.s32.totalorder %s555_s14, 3 }
  0x1d   : > { %p187_p9 = pnand %p475_p7, %p186_p8 }
  0x1e   : > { %s193_s28 = sand.u32 (!%p187_p9), 1, %s547_s12  }
  0x1f   : > { %190 = sbr.rel (%p187_p9) target bundleno = 267 (0x10b), region = 51  ;;  %s476_s29 = sshll.u32 (!%p187_p9), %s193_s28, 7 }
  0x20   : > { %s650_s7 = scalar_lea.vmem (!%p187_p9), [#allocation2], %s476_s29  ;;  %s477_s27 = sshll.u32 (!%p187_p9), %s193_s28, 6 }
  0x21   : > { %s694_s29 = scalar_lea.vmem (!%p187_p9), [#allocation3], %s477_s27 }
  0x24   : > { %v557_v16 = vmov 0.0   ;;  %v239_v17 = vld [vmem:[%s731_s2 + $0x10] sm:$0xff]  ;;  %v237_v18 = vld [vmem:[%s731_s2] sm:$0xff]  ;;  %v558_v19 = vmov 0   ;;  %v236_v20 = vld [vmem:[%s650_s7 + $0x78] sm:$0xff]  ;;  %vm261_vm0 = vcmask 523264  }
  0x25   : > { %338 = vmatprep.mubr.f32.mxu0 %v557_v16  ;;  %350 = vmatprep.mubr.f32.mxu1 %v557_v16  ;;  %v235_v21 = vld [vmem:[%s650_s7 + $0x70] sm:$0xff]  ;;  %v234_v22 = vld [vmem:[%s650_s7 + $0x68] sm:$0xff]  ;;  %v233_v23 = vld [vmem:[%s650_s7 + $0x60] sm:$0xff]  ;;  %s488_s12 = sshll.u32 (%p609_p5), %s468_s15, 4 }
  0x26   : > { %532 = vset.pattern.permute.xlu1 %v558_v19  ;;  %531 = vset.pattern.permute.xlu0 %v558_v19  ;;  %v232_v24 = vld [vmem:[%s650_s7 + $0x58] sm:$0xff]  ;;  %v231_v25 = vld [vmem:[%s650_s7 + $0x50] sm:$0xff]  ;;  %v230_v26 = vld [vmem:[%s650_s7 + $0x48] sm:$0xff]  ;;  %s380_s4 = scalar_lea.vmem (%p609_p5), %s732_s3, %s488_s12 }
  0x27   : > { %253 = vperm.xlu1 %532, %v239_v17   ;;  %243 = vperm.xlu0 %531, %v237_v18   ;;  %v229_v27 = vld [vmem:[%s650_s7 + $0x40] sm:$0xff]  ;;  %v228_v28 = vld [vmem:[%s650_s7 + $0x38] sm:$0xff]  ;;  %v227_v29 = vld [vmem:[%s650_s7 + $0x30] sm:$0xff] }
  0x28   : > { %290 = vmatprep.subr.mxu0 %v236_v20  ;;  %489 = vmatprep.subr.mxu1 %v236_v20  ;;  %v226_v30 = vld [vmem:[%s650_s7 + $0x28] sm:$0xff]  ;;  %v225_v31 = vld [vmem:[%s650_s7 + $0x20] sm:$0xff]  ;;  %v224_v32 = vld [vmem:[%s650_s7 + $0x18] sm:$0xff] }
  0x29   : > { %291 = vmatpush1.msra.mxu0 %v235_v21  ;;  %497 = vmatpush1.msra.mxu1 %v235_v21  ;;  %v223_v33 = vld [vmem:[%s650_s7 + $0x10] sm:$0xff]  ;;  %v222_v34 = vld [vmem:[%s650_s7 + $0x8] sm:$0xff]  ;;  %v221_v35 = vld [vmem:[%s650_s7] sm:$0xff] }
  0x2a   : > { %292 = vmatprep.subr.mxu0 %v234_v22  ;;  %490 = vmatprep.subr.mxu1 %v234_v22  ;;  %v217_v36 = vld [vmem:[%s730_s1] sm:$0xff]  ;;  %v219_v37 = vld [vmem:[%s730_s1 + $0x10] sm:$0xff]  ;;  %v240_v38 = vld [vmem:[%s731_s2 + $0x18] sm:$0xff] }
  0x2b   : > { %293 = vmatpush1.msra.mxu0 %v233_v23  ;;  %498 = vmatpush1.msra.mxu1 %v233_v23  ;;  %v238_v39 = vld [vmem:[%s731_s2 + $0x8] sm:$0xff]  ;;  %v220_v41 = vld [vmem:[%s730_s1 + $0x18] sm:$0xff] }
  0x2c   : > { %294 = vmatprep.subr.mxu0 %v232_v24  ;;  %491 = vmatprep.subr.mxu1 %v232_v24  ;;  %v218_v40 = vld [vmem:[%s730_s1 + $0x8] sm:$0xff] }
  0x2d   : > { %295 = vmatpush1.msra.mxu0 %v231_v25  ;;  %499 = vmatpush1.msra.mxu1 %v231_v25 }
  0x2e   : > { %296 = vmatprep.subr.mxu0 %v230_v26  ;;  %492 = vmatprep.subr.mxu1 %v230_v26 }
  0x2f   : > { %297 = vmatpush1.msra.mxu0 %v229_v27  ;;  %500 = vmatpush1.msra.mxu1 %v229_v27 }
  0x30   : > { %298 = vmatprep.subr.mxu0 %v228_v28  ;;  %493 = vmatprep.subr.mxu1 %v228_v28 }
  0x31   : > { %299 = vmatpush1.msra.mxu0 %v227_v29  ;;  %501 = vmatpush1.msra.mxu1 %v227_v29 }
  0x32   : > { %300 = vmatprep.subr.mxu0 %v226_v30  ;;  %494 = vmatprep.subr.mxu1 %v226_v30 }
  0x33   : > { %301 = vmatpush1.msra.mxu0 %v225_v31  ;;  %502 = vmatpush1.msra.mxu1 %v225_v31 }
  0x34   : > { %302 = vmatprep.subr.mxu0 %v224_v32  ;;  %495 = vmatprep.subr.mxu1 %v224_v32 }
  0x35   : > { %303 = vmatpush1.msra.mxu0 %v223_v33  ;;  %503 = vmatpush1.msra.mxu1 %v223_v33 }
  0x36   : > { %304 = vmatprep.subr.mxu0 %v222_v34  ;;  %496 = vmatprep.subr.mxu1 %v222_v34 }
  0x37   : > { %305 = vmatpush1.msra.mxu0 %v221_v35  ;;  %504 = vmatpush1.msra.mxu1 %v221_v35 }
  0x38   : > { %478 = vmatmul.mubr.msk.f32.vlgmr.msra.gmra.mxu0 %vm261_vm0, %v217_v36  ;;  %480 = vmatmul.mubr.msk.f32.vlgmr.msra.gmra.mxu1 %vm261_vm0, %v219_v37 }
  0x39   : > { %344 = vmatprep.mubr.f32.mxu0 %v557_v16  ;;  %356 = vmatprep.mubr.f32.mxu1 %v557_v16 }
  0x3a   : > { %258 = vperm.xlu1 %532, %v240_v38   ;;  %248 = vperm.xlu0 %531, %v238_v39  }
  0x3c   : > { %479 = vmatmul.mubr.msk.f32.gmra.mxu0 %vm261_vm0, %v218_v40  ;;  %481 = vmatmul.mubr.msk.f32.gmra.mxu1 %vm261_vm0, %v220_v41 }
  0xa2   : > { %v254_v42 = vpop.permute.xlu1 %253  ;;  %v244_v43 = vpop.permute.xlu0 %243 }
  0xb5   : > { %v259_v50 = vpop.permute.xlu1 %258  ;;  %v249_v51 = vpop.permute.xlu0 %248 }
  0xf8   : > { %v340_v44 = vpop.f32.mrf.mxu0  ;;  %v352_v45 = vpop.f32.mrf.mxu1 }
  0xf9   : > { %v341_v46 = vadd.f32 %v340_v44, %v244_v43  ;;  %v353_v47 = vadd.f32 %v352_v45, %v254_v42 }
  0xfa   : > { %v342_v48 = vpop.f32.mrf.mxu0  ;;  %v354_v49 = vpop.f32.mrf.mxu1 }
  0xfb   : > { %363 = vst [vmem:[%s694_s29] sm:$0xff] %v341_v46  ;;  %367 = vst [vmem:[%s694_s29 + $0x20] sm:$0xff] %v353_v47  ;;  %v343_v52 = vadd.f32 %v342_v48, %v244_v43  ;;  %v355_v53 = vadd.f32 %v354_v49, %v254_v42 }
  0xfc   : > { %v346_v54 = vpop.f32.mrf.mxu0  ;;  %v358_v55 = vpop.f32.mrf.mxu1 }
  0xfd   : > { %364 = vst [vmem:[%s694_s29 + $0x8] sm:$0xff] %v343_v52  ;;  %368 = vst [vmem:[%s694_s29 + $0x28] sm:$0xff] %v355_v53  ;;  %v347_v56 = vadd.f32 %v346_v54, %v249_v51  ;;  %v359_v57 = vadd.f32 %v358_v55, %v259_v50  ;;  %377 = sbr.rel (!%p609_p5) target bundleno = 267 (0x10b), region = 59 }
  0xfe   : > { %v348_v58 = vpop.f32.mrf.mxu0  ;;  %v360_v59 = vpop.f32.mrf.mxu1 }
  0xff   : > { %365 = vst [vmem:[%s694_s29 + $0x10] sm:$0xff] %v347_v56  ;;  %369 = vst [vmem:[%s694_s29 + $0x30] sm:$0xff] %v359_v57  ;;  %v349_v60 = vadd.f32 %v348_v58, %v249_v51  ;;  %v361_v61 = vadd.f32 %v360_v59, %v259_v50 }
 0x101   : > { %366 = vst [vmem:[%s694_s29 + $0x18] sm:$0xff] %v349_v60  ;;  %370 = vst [vmem:[%s694_s29 + $0x38] sm:$0xff] %v361_v61 }
 0x102   : > { %v393_v62 = vld [vmem:[%s694_s29] sm:$0xff] }
 0x103   : > { %v401_v2 = vld [vmem:[%s694_s29 + $0x20] sm:$0xff]  ;;  %394 = vst [vmem:[%s380_s4] sm:$0xff] %v393_v62 }
 0x104   : > { %v395_v63 = vld [vmem:[%s694_s29 + $0x8] sm:$0xff]  ;;  %402 = vst [vmem:[%s380_s4 + $0x40] sm:$0xff] %v401_v2 }
 0x105   : > { %v403_v3 = vld [vmem:[%s694_s29 + $0x28] sm:$0xff]  ;;  %396 = vst [vmem:[%s380_s4 + $0x8] sm:$0xff] %v395_v63 }
 0x106   : > { %v397_v0 = vld [vmem:[%s694_s29 + $0x10] sm:$0xff]  ;;  %404 = vst [vmem:[%s380_s4 + $0x48] sm:$0xff] %v403_v3 }
 0x107   : > { %398 = vst [vmem:[%s380_s4 + $0x20] sm:$0xff] %v397_v0  ;;  %v405_v4 = vld [vmem:[%s694_s29 + $0x30] sm:$0xff] }
 0x108   : > { %v399_v1 = vld [vmem:[%s694_s29 + $0x18] sm:$0xff]  ;;  %406 = vst [vmem:[%s380_s4 + $0x60] sm:$0xff] %v405_v4 }
 0x109   : > { %400 = vst [vmem:[%s380_s4 + $0x28] sm:$0xff] %v399_v1  ;;  %v407_v5 = vld [vmem:[%s694_s29 + $0x38] sm:$0xff] }
 0x10a   : > { %408 = vst [vmem:[%s380_s4 + $0x68] sm:$0xff] %v407_v5 }
 0x10b PF: > { %p10_p10 = scmp.ge.s32.totalorder %s596_s16, 4   ;;  %s734_s12 = smov %s551_s13 }
 0x10c   : > { %s735_s13 = smov %s607_s19  ;;  %s736_s14 = smov %s596_s16 }
 0x10d   :  { %12 = sbr.rel (!%p10_p10) target bundleno = 2 (0x2), region = 113 }

</bundles_post_ra>
